<compile_context>
chip_gen: v7x
topology: tpu7x:2x2x1
jax: 0.10.0
libtpu: 0.0.40
codegen_flags: <defaults>
</compile_context>

<pallas_src>
import functools

import jax
import jax.numpy as jnp
from jax import lax
from jax.experimental import pallas as pl
from jax.experimental.pallas import tpu as pltpu


_MIB = 1024 * 1024
_F32_TEMPS = 3  # approx. live f32 temporaries per tile element (x_f32, centered, centered^2)


def _layernorm_dp_kernel(x_ref, g_ref, b_ref, o_ref, *, inv_c, eps):
    # x_ref / o_ref: (TILE_B, C, TILE_T);  g_ref / b_ref: (C, 1)
    x = x_ref[...].astype(jnp.float32)
    mean = jnp.sum(x, axis=1, keepdims=True) * inv_c              # (TB, 1, TT)
    centered = x - mean
    var = jnp.sum(centered * centered, axis=1, keepdims=True) * inv_c
    inv_std = lax.rsqrt(var + eps)                                # EUP rsqrt
    g = g_ref[...].astype(jnp.float32)[None]                      # (1, C, 1)
    b = b_ref[...].astype(jnp.float32)[None]
    o_ref[...] = (centered * inv_std * g + b).astype(o_ref.dtype)


def _vmem_caps():
    """(physical VMEM bytes, scoped-limit bytes) — generation aware."""
    try:
        cap = int(pltpu.get_tpu_info().vmem_capacity_bytes)
    except Exception:  # conservative fallback (v7x-sized)
        cap = 64 * _MIB
    limit = min((cap * 3) // 4, 100 * _MIB)   # ~48 MiB on v7x, ~96 MiB on v5e/v6e
    return cap, limit


def _choose_tiles(B, C, T, itemsize, ws_budget, tile_b, tile_t):
    """Pick (TILE_B, TILE_T) so the real per-step working set fits ws_budget."""
    # 2x double-buffered input + 2x double-buffered output in x.dtype,
    # plus ~3 tile-sized f32 temporaries from the compute chain.
    per_elem = 4 * int(itemsize) + 4 * _F32_TEMPS
    elem_budget = max(ws_budget // per_elem, 1)
    cols_budget = max(elem_budget // C, 1)       # (batch*time) columns per step

    if tile_t is None:
        if T <= cols_budget:
            tile_t = T                            # full T fits -> lane-dense
        elif cols_budget >= 128:
            tile_t = (cols_budget // 128) * 128   # largest multiple of 128
        else:
            # Huge-C guard: even one 128-lane tile exceeds the budget; fall back
            # to the narrowest legal lane tile rather than blowing VMEM.
            # TODO(synk): add a C-split two-pass stats path for very large C.
            tile_t = T if T < 128 else 128
    else:
        assert tile_t == T or tile_t % 128 == 0, (
            "tile_t must equal T or be a multiple of 128")

    if tile_b is None:
        tile_b = max(1, min(B, cols_budget // max(tile_t, 1)))

    # Keep the grid >= 2 steps when possible so v7x's two TensorCores both work.
    if pl.cdiv(B, tile_b) * pl.cdiv(T, tile_t) == 1:
        if B > 1:
            tile_b = pl.cdiv(B, 2)
        elif T >= 256 and tile_t == T:
            tile_t = ((pl.cdiv(T, 2) + 127) // 128) * 128

    ws_bytes = tile_b * C * tile_t * per_elem
    return tile_b, tile_t, ws_bytes


def layernorm_dp(x, gamma, beta, *, eps=1e-4, tile_b=None, tile_t=None):
    """x: (B, C, *spatial). gamma, beta: (C,). Returns same shape as x."""
    orig_shape = x.shape
    assert x.ndim >= 2, "expect at least (B, C)"
    B, C = int(orig_shape[0]), int(orig_shape[1])
    T = 1
    for d in orig_shape[2:]:
        T *= int(d)
    if x.ndim != 3:
        x = x.reshape(B, C, T)  # trailing-dim flatten keeps the (B, C, T) layout

    cap, vmem_limit = _vmem_caps()
    ws_budget = (vmem_limit * 7) // 8
    tile_b, tile_t, ws_bytes = _choose_tiles(
        B, C, T, x.dtype.itemsize, ws_budget, tile_b, tile_t)
    # Never set the scoped limit below the actual working set; stay under HW cap.
    vmem_limit = min(max(vmem_limit, ws_bytes + 4 * _MIB), cap)

    grid = (pl.cdiv(B, tile_b), pl.cdiv(T, tile_t))

    g2d = gamma.reshape(C, 1)
    b2d = beta.reshape(C, 1)

    kernel = functools.partial(
        _layernorm_dp_kernel, inv_c=1.0 / float(C), eps=float(eps))

    out = pl.pallas_call(
        kernel,
        out_shape=jax.ShapeDtypeStruct((B, C, T), x.dtype),
        grid_spec=pltpu.PrefetchScalarGridSpec(
            num_scalar_prefetch=0,
            grid=grid,
            in_specs=[
                pl.BlockSpec((tile_b, C, tile_t), lambda bi, ti: (bi, 0, ti)),
                pl.BlockSpec((C, 1), lambda bi, ti: (0, 0)),   # gamma (resident)
                pl.BlockSpec((C, 1), lambda bi, ti: (0, 0)),   # beta  (resident)
            ],
            out_specs=pl.BlockSpec((tile_b, C, tile_t),
                                   lambda bi, ti: (bi, 0, ti)),
        ),
        compiler_params=pltpu.CompilerParams(
            dimension_semantics=("parallel", "parallel"),
            vmem_limit_bytes=int(vmem_limit),
        ),
    )(x, g2d, b2d)

    return out.reshape(orig_shape)


def layernorm_dp_ref(x, gamma, beta, eps=1e-4):
    # pure-JAX reference mirroring the PyTorch forward
    mean = jnp.mean(x, axis=1, keepdims=True)
    var = jnp.mean((x - mean) ** 2, axis=1, keepdims=True)
    xn = (x - mean) * lax.rsqrt(var + eps)
    shape = (1, -1) + (1,) * (x.ndim - 2)
    return xn * gamma.reshape(shape) + beta.reshape(shape)


if __name__ == "__main__":
    # --- test 1: module-default params (gamma=1, beta=0), tiny-T NCW shape ---
    key = jax.random.PRNGKey(0)
    B, C, T = 2, 32, 8
    x = jax.random.normal(key, (B, C, T), dtype=jnp.float32)
    gamma = jnp.ones((C,), dtype=jnp.float32)
    beta = jnp.zeros((C,), dtype=jnp.float32)

    y = jax.block_until_ready(layernorm_dp(x, gamma, beta, eps=1e-4))
    y_ref = layernorm_dp_ref(x, gamma, beta, eps=1e-4)
    assert y.shape == (B, C, T)
    assert jnp.max(jnp.abs(y - y_ref)) < 1e-5

    # --- test 2: ragged T boundary tile + C not a multiple of 8 (padded
    #             sublanes must not leak into the channel reduction) ---------
    k1, k2, k3 = jax.random.split(jax.random.PRNGKey(1), 3)
    B2, C2, T2 = 2, 10, 300
    x2 = jax.random.normal(k1, (B2, C2, T2), dtype=jnp.float32)
    g2 = jax.random.normal(k2, (C2,), dtype=jnp.float32)
    b2 = jax.random.normal(k3, (C2,), dtype=jnp.float32)

    y2 = jax.block_until_ready(layernorm_dp(x2, g2, b2, eps=1e-4, tile_t=128))
    y2_ref = layernorm_dp_ref(x2, g2, b2, eps=1e-4)
    assert y2.shape == (B2, C2, T2)
    assert jnp.max(jnp.abs(y2 - y2_ref)) < 1e-4

    print("KERNEL_OK")
</pallas_src>

<mosaic_0001>
module attributes {stable_mosaic.version = 11 : i64} {
  func.func @_layernorm_dp_kernel(%arg0: i32, %arg1: i32, %arg2: memref<1x32x8xf32, #tpu.memory_space<vmem>>, %arg3: memref<32x1xf32, #tpu.memory_space<vmem>>, %arg4: memref<32x1xf32, #tpu.memory_space<vmem>>, %arg5: memref<1x32x8xf32, #tpu.memory_space<vmem>>) attributes {dimension_semantics = [#tpu.dimension_semantics<parallel>, #tpu.dimension_semantics<parallel>], iteration_bounds = array<i64: 2, 1>, scalar_prefetch = 0 : i64, scratch_operands = 0 : i64, tpu.core_type = #tpu.core_type<tc>, window_params = [{transform_indices = @transform_0, window_bounds = array<i64: 1, 32, 8>}, {pipeline_mode = #tpu.pipeline_mode<synchronous>, transform_indices = @transform_1, window_bounds = array<i64: 32, 1>}, {pipeline_mode = #tpu.pipeline_mode<synchronous>, transform_indices = @transform_2, window_bounds = array<i64: 32, 1>}, {transform_indices = @transform_3, window_bounds = array<i64: 1, 32, 8>}]} {
    %c0 = arith.constant 0 : index
    %c0_0 = arith.constant 0 : index
    %c0_1 = arith.constant 0 : index
    %0 = vector.load %arg2[%c0, %c0_0, %c0_1] : memref<1x32x8xf32, #tpu.memory_space<vmem>>, vector<1x32x8xf32>
    %cst = arith.constant dense<0.000000e+00> : vector<1x8xf32>
    %1 = vector.multi_reduction <add>, %0, %cst [1] : vector<1x32x8xf32> to vector<1x8xf32>
    %2 = vector.shape_cast %1 : vector<1x8xf32> to vector<1x1x8xf32>
    %cst_2 = arith.constant 3.125000e-02 : f32
    %3 = vector.broadcast %cst_2 : f32 to vector<1x1x8xf32>
    %4 = arith.mulf %2, %3 : vector<1x1x8xf32>
    %5 = vector.broadcast %4 : vector<1x1x8xf32> to vector<1x32x8xf32>
    %6 = arith.subf %0, %5 : vector<1x32x8xf32>
    %7 = arith.mulf %6, %6 : vector<1x32x8xf32>
    %cst_3 = arith.constant dense<0.000000e+00> : vector<1x8xf32>
    %8 = vector.multi_reduction <add>, %7, %cst_3 [1] : vector<1x32x8xf32> to vector<1x8xf32>
    %9 = vector.shape_cast %8 : vector<1x8xf32> to vector<1x1x8xf32>
    %cst_4 = arith.constant 3.125000e-02 : f32
    %10 = vector.broadcast %cst_4 : f32 to vector<1x1x8xf32>
    %11 = arith.mulf %9, %10 : vector<1x1x8xf32>
    %cst_5 = arith.constant 9.99999974E-5 : f32
    %12 = vector.broadcast %cst_5 : f32 to vector<1x1x8xf32>
    %13 = arith.addf %11, %12 : vector<1x1x8xf32>
    %14 = math.rsqrt %13 : vector<1x1x8xf32>
    %c0_6 = arith.constant 0 : index
    %c0_7 = arith.constant 0 : index
    %15 = vector.load %arg3[%c0_6, %c0_7] : memref<32x1xf32, #tpu.memory_space<vmem>>, vector<32x1xf32>
    %16 = vector.shape_cast %15 : vector<32x1xf32> to vector<1x32x1xf32>
    %c0_8 = arith.constant 0 : index
    %c0_9 = arith.constant 0 : index
    %17 = vector.load %arg4[%c0_8, %c0_9] : memref<32x1xf32, #tpu.memory_space<vmem>>, vector<32x1xf32>
    %18 = vector.shape_cast %17 : vector<32x1xf32> to vector<1x32x1xf32>
    %19 = vector.broadcast %14 : vector<1x1x8xf32> to vector<1x32x8xf32>
    %20 = arith.mulf %6, %19 : vector<1x32x8xf32>
    %21 = vector.broadcast %16 : vector<1x32x1xf32> to vector<1x32x8xf32>
    %22 = arith.mulf %20, %21 : vector<1x32x8xf32>
    %23 = vector.broadcast %18 : vector<1x32x1xf32> to vector<1x32x8xf32>
    %24 = arith.addf %22, %23 : vector<1x32x8xf32>
    %c0_10 = arith.constant 0 : index
    %c0_11 = arith.constant 0 : index
    %c0_12 = arith.constant 0 : index
    %25 = vector.load %arg5[%c0_10, %c0_11, %c0_12] : memref<1x32x8xf32, #tpu.memory_space<vmem>>, vector<1x32x8xf32>
    tpu.vector_store %arg5[%c0_10, %c0_11, %c0_12], %24 {strides = array<i32>} : memref<1x32x8xf32, #tpu.memory_space<vmem>>, vector<1x32x8xf32>,
    return
  }
  func.func @transform_0(%arg0: i32, %arg1: i32) -> (i32, i32, i32) {
    %c0_i32 = arith.constant 0 : i32
    %c0_i32_0 = arith.constant 0 : i32
    return %arg0, %c0_i32, %arg1 : i32, i32, i32
  }
  func.func @transform_1(%arg0: i32, %arg1: i32) -> (i32, i32) {
    %c0_i32 = arith.constant 0 : i32
    %c0_i32_0 = arith.constant 0 : i32
    %c0_i32_1 = arith.constant 0 : i32
    return %c0_i32, %c0_i32_0 : i32, i32
  }
  func.func @transform_2(%arg0: i32, %arg1: i32) -> (i32, i32) {
    %c0_i32 = arith.constant 0 : i32
    %c0_i32_0 = arith.constant 0 : i32
    %c0_i32_1 = arith.constant 0 : i32
    return %c0_i32, %c0_i32_0 : i32, i32
  }
  func.func @transform_3(%arg0: i32, %arg1: i32) -> (i32, i32, i32) {
    %c0_i32 = arith.constant 0 : i32
    %c0_i32_0 = arith.constant 0 : i32
    return %arg0, %c0_i32, %arg1 : i32, i32, i32
  }
}

</mosaic_0001>

<bundles_post_ra>
// kernel: tpu_custom_call.1
= control target key start
LH: loop header
LB: loop body
LE: loop exit
PB: predicated region body
PF: predicated region fallthrough
CT: control target
= control target key end

     0   :  { %s479_s12 = smov 0   ;;  %s481_s13 = smov 0   ;;  %s555_s0 = inlined_call_operand.vmem [shape: f32[2,32,8], index: 0, kind: input, shape index: {}]   ;;  %s556_s1 = inlined_call_operand.vmem [shape: f32[32,1], index: 1, kind: input, shape index: {}]   ;;  %s557_s2 = inlined_call_operand.vmem [shape: f32[32,1], index: 2, kind: input, shape index: {}]   ;;  %s558_s3 = inlined_call_operand.vmem [shape: f32[2,32,8], index: 3, kind: output, shape index: {}]  }
   0x1   :  { %s483_s14 = smov 0  }
   0x2 LB: > { %s25_s15 = sadd.s32 1, %s452_s13  ;;  %p396_p0 = scmp.ge.s32.totalorder %s456_s14, 1  ;;  %s456_s14 = sphi %s483_s14, %s13_s14   ;;  %s452_s13 = sphi %s481_s13, %s560_s13   ;;  %s448_s12 = sphi %s479_s12, %s559_s12  }
   0x3   : > { %p27_p1 = scmp.ge.s32.totalorder %s25_s15, 2  ;;  %p156_p2 = scmp.lt.s32.totalorder %s456_s14, 3 }
   0x5   : > { %s562_s15 = smov (%p27_p1, %s25_s15), 0  ;;  %p157_p3 = pnand %p396_p0, %p156_p2 }
   0x6   : > { %v247_v0 = vld [vmem:[%s556_s1 + $0x10] sm:$0xff] (!%p157_p3)  ;;  %v245_v1 = vld [vmem:[%s556_s1] sm:$0xff] (!%p157_p3)  ;;  %v458_v2 = vmov (!%p157_p3), 0   ;;  %v248_v3 = vld [vmem:[%s556_s1 + $0x18] sm:$0xff] (!%p157_p3)  ;;  %p186_p4 = scmp.lt.s32.totalorder (!%p157_p3), %s448_s12, 1  ;;  %vm206_vm0 = vcmask (!%p157_p3), 64512  }
   0x7   : > { %160 = sbr.rel (%p157_p3) target bundleno = 151 (0x97), region = 32  ;;  %431 = vset.pattern.permute.xlu1 (!%p157_p3), %v458_v2  ;;  %430 = vset.pattern.permute.xlu0 (!%p157_p3), %v458_v2  ;;  %v246_v4 = vld [vmem:[%s556_s1 + $0x8] sm:$0xff] (!%p157_p3)  ;;  %v249_v6 = vld [vmem:[%s557_s2] sm:$0xff] (!%p157_p3)  ;;  %v252_v7 = vld [vmem:[%s557_s2 + $0x18] sm:$0xff] (!%p157_p3) }
   0x8   : > { %269 = vperm.xlu1 (!%p157_p3), %431, %v247_v0   ;;  %259 = vperm.xlu0 (!%p157_p3), %430, %v245_v1   ;;  %v250_v5 = vld [vmem:[%s557_s2 + $0x8] sm:$0xff] (!%p157_p3)  ;;  %v251_v8 = vld [vmem:[%s557_s2 + $0x10] sm:$0xff] (!%p157_p3) }
   0xc   : > { %274 = vperm.xlu1 (!%p157_p3), %431, %v248_v3   ;;  %264 = vperm.xlu0 (!%p157_p3), %430, %v246_v4  }
   0xe   : > { %s564_s12 = smov (!%p186_p4, %s448_s12), 1 }
   0xf   : > { %s403_s5 = sshll.u32 %s564_s12, 5 }
  0x10   : > { %288 = vperm.xlu1 %431, %v250_v5   ;;  %283 = vperm.xlu0 %430, %v249_v6   ;;  %s193_s8 = scalar_lea.vmem %s555_s0, %s403_s5  ;;  %s201_s11 = scalar_lea.vmem %s558_s3, %s403_s5 }
  0x11   : > { %v202_v9 = vld [vmem:[%s193_s8] sm:$0xff]  ;;  %v203_v10 = vld [vmem:[%s193_s8 + $0x8] sm:$0xff]  ;;  %v204_v13 = vld [vmem:[%s193_s8 + $0x10] sm:$0xff] }
  0x12   : > { %v207_v11 = vsel %vm206_vm0, %v202_v9, 0.0  ;;  %v208_v12 = vsel %vm206_vm0, %v203_v10, 0.0  ;;  %v210_v15 = vsel %vm206_vm0, %v204_v13, 0.0  ;;  %v205_v16 = vld [vmem:[%s193_s8 + $0x18] sm:$0xff] }
  0x13   : > { %v209_v14 = vadd.f32 %v208_v12, %v207_v11  ;;  %v212_v18 = vsel %vm206_vm0, %v205_v16, 0.0 }
  0x14   : > { %298 = vperm.xlu1 %431, %v252_v7   ;;  %293 = vperm.xlu0 %430, %v251_v8  }
  0x15   : > { %v211_v17 = vadd.f32 %v210_v15, %v209_v14 }
  0x17   : > { %v213_v19 = vadd.f32 %v212_v18, %v211_v17 }
  0x19   : > { %v214_v20 = vrot.slane %v213_v19, 4 }
  0x1b   : > { %v215_v21 = vadd.f32 %v214_v20, %v213_v19 }
  0x1d   : > { %v216_v22 = vrot.slane %v215_v21, 2 }
  0x1f   : > { %v217_v23 = vadd.f32 %v216_v22, %v215_v21 }
  0x21   : > { %v218_v24 = vrot.slane %v217_v23, 1 }
  0x23   : > { %v219_v25 = vadd.f32 %v218_v24, %v217_v23 }
  0x25   : > { %v220_v26 = vmul.f32 0.03125, %v219_v25 }
  0x27   : > { %v221_v27 = vsub.f32 %v202_v9, %v220_v26  ;;  %v222_v28 = vsub.f32 %v203_v10, %v220_v26  ;;  %v223_v29 = vsub.f32 %v204_v13, %v220_v26  ;;  %v224_v32 = vsub.f32 %v205_v16, %v220_v26 }
  0x29   : > { %v225_v30 = vmul.f32 %v221_v27, %v221_v27  ;;  %v226_v31 = vmul.f32 %v222_v28, %v222_v28  ;;  %v227_v33 = vmul.f32 %v223_v29, %v223_v29  ;;  %v228_v37 = vmul.f32 %v224_v32, %v224_v32 }
  0x2b   : > { %v229_v34 = vsel %vm206_vm0, %v225_v30, 0.0  ;;  %v230_v35 = vsel %vm206_vm0, %v226_v31, 0.0  ;;  %v232_v38 = vsel %vm206_vm0, %v227_v33, 0.0  ;;  %v234_v40 = vsel %vm206_vm0, %v228_v37, 0.0 }
  0x2c   : > { %v231_v36 = vadd.f32 %v230_v35, %v229_v34 }
  0x2e   : > { %v233_v39 = vadd.f32 %v232_v38, %v231_v36 }
  0x30   : > { %v235_v41 = vadd.f32 %v234_v40, %v233_v39 }
  0x32   : > { %v236_v42 = vrot.slane %v235_v41, 4 }
  0x34   : > { %v237_v43 = vadd.f32 %v236_v42, %v235_v41 }
  0x36   : > { %v238_v44 = vrot.slane %v237_v43, 2 }
  0x38   : > { %v239_v45 = vadd.f32 %v238_v44, %v237_v43 }
  0x3a   : > { %v240_v46 = vrot.slane %v239_v45, 1 }
  0x3c   : > { %v241_v47 = vadd.f32 %v240_v46, %v239_v45 }
  0x3e   : > { %v242_v48 = vmul.f32 0.03125, %v241_v47 }
  0x40   : > { %v243_v49 = vadd.f32 0.0001, %v242_v48 }
  0x42   : > { %432 = vrsqrt.f32 %v243_v49 }
  0x4c   : > { %v433_v50 = vpop.eup %432 }
  0x4d   : > { %v253_v53 = vmul.f32 %v433_v50, %v221_v27  ;;  %v254_v54 = vmul.f32 %v433_v50, %v222_v28  ;;  %v255_v57 = vmul.f32 %v433_v50, %v223_v29  ;;  %v256_v59 = vmul.f32 %v433_v50, %v224_v32 }
  0x87   : > { %v270_v51 = vpop.permute.xlu1 %269  ;;  %v260_v52 = vpop.permute.xlu0 %259 }
  0x88   : > { %v277_v58 = vmul.f32 %v260_v52, %v253_v53  ;;  %v279_v1 = vmul.f32 %v270_v51, %v255_v57 }
  0x8b   : > { %v275_v55 = vpop.permute.xlu1 %274  ;;  %v265_v56 = vpop.permute.xlu0 %264 }
  0x8c   : > { %v278_v60 = vmul.f32 %v265_v56, %v254_v54  ;;  %v280_v2 = vmul.f32 %v275_v55, %v256_v59 }
  0x8f   : > { %v289_v61 = vpop.permute.xlu1 %288  ;;  %v284_v62 = vpop.permute.xlu0 %283 }
  0x90   : > { %v302_v63 = vadd.f32 %v289_v61, %v278_v60  ;;  %v301_v0 = vadd.f32 %v284_v62, %v277_v58 }
  0x92   : > { %306 = vst.msk [vmem:[%s201_s11 + $0x8] sm:$0xff] %vm206_vm0, %v302_v63  ;;  %305 = vst.msk [vmem:[%s201_s11] sm:$0xff] %vm206_vm0, %v301_v0 }
  0x93   : > { %v299_v3 = vpop.permute.xlu1 %298  ;;  %v294_v4 = vpop.permute.xlu0 %293 }
  0x94   : > { %v304_v5 = vadd.f32 %v299_v3, %v280_v2  ;;  %v303_v6 = vadd.f32 %v294_v4, %v279_v1 }
  0x96   : > { %308 = vst.msk [vmem:[%s201_s11 + $0x18] sm:$0xff] %vm206_vm0, %v304_v5  ;;  %307 = vst.msk [vmem:[%s201_s11 + $0x10] sm:$0xff] %vm206_vm0, %v303_v6 }
  0x97 PF: > { %s13_s14 = sadd.s32 1, %s456_s14   ;;  %s559_s12 = smov %s452_s13 }
  0x98   : > { %p10_p5 = scmp.ge.s32.totalorder %s13_s14, 4   ;;  %s560_s13 = smov %s562_s15 }
  0x9a   :  { %12 = sbr.rel (!%p10_p5) target bundleno = 2 (0x2), region = 62 }

</bundles_post_ra>
